<compile_context>
chip_gen: v7x
topology: tpu7x:2x2x1
jax: 0.10.0
libtpu: 0.0.40
codegen_flags: <defaults>
</compile_context>

<pallas_src>
import functools

import jax
import jax.numpy as jnp
from jax import lax
from jax.experimental import pallas as pl
from jax.experimental.pallas import tpu as pltpu


def _round_up(x, m):
    return ((x + m - 1) // m) * m


def _prep(a, shape):
    """Cast to f32 and zero-pad to `shape` (no-ops if already conforming)."""
    if a.dtype != jnp.float32:
        a = a.astype(jnp.float32)
    if a.shape != shape:
        a = jnp.pad(a, [(0, t - s) for s, t in zip(a.shape, shape)])
    return a


def _crop(a, shape):
    if a.shape == shape:
        return a
    return a[tuple(slice(0, s) for s in shape)]


def _pick(dim, candidates):
    for c in candidates:
        if dim % c == 0:
            return c
    return 128


def _pick_t_out(out_p):
    # Prefer big tiles, but keep >= 2 Out tiles when possible so the
    # "parallel" grid axis feeds both TensorCores on v7x.
    for c in (512, 256):
        if out_p % c == 0 and out_p // c >= 2:
            return c
    return 128


def _vmem_limit(nbytes):
    nbytes = int(nbytes * 1.25) + (4 << 20)      # headroom for internal scratch
    return max(32 << 20, min(nbytes, 96 << 20))


# -----------------------------------------------------------------------------
# Single-step kernel: grid = (Out tiles [parallel], In tiles [reduction]).
# -----------------------------------------------------------------------------
def _ltd_step_kernel(x_ref, w_ref, trace_ref, s_ref, dw_ref, trace_out_ref,
                     acc_ref, *, v_threshold, decay):
    k = pl.program_id(1)

    x = x_ref[...]                               # (Bp, t_in)
    # Partial i = x @ W.T for this (out, in) tile; contract on existing last
    # axes so no transpose/relayout is materialized before the MXU.
    part = lax.dot_general(x, w_ref[...], (((1,), (1,)), ((), ())),
                           preferred_element_type=jnp.float32)  # (Bp, t_out)

    @pl.when(k == 0)
    def _():
        acc_ref[...] = part                      # direct store: no zero pass

    @pl.when(k > 0)
    def _():
        acc_ref[...] += part

    # Decayed previous trace for this Out tile (k-invariant, tiny VPU op).
    trace_ret = trace_ref[...] * decay           # (Bp, t_out)

    # dW tile = trace_ret.T @ x: contract over the batch axis (axis 0 of both).
    dw_ref[...] = lax.dot_general(
        trace_ret, x, (((0,), (0,)), ((), ())),
        preferred_element_type=jnp.float32).astype(dw_ref.dtype)  # (t_out, t_in)

    @pl.when(k == pl.num_programs(1) - 1)
    def _():
        s = (acc_ref[...] > v_threshold).astype(jnp.float32)
        s_ref[...] = s
        trace_out_ref[...] = trace_ret + s


def ltd_forward(x, weight, trace_prev, *, v_threshold=0.5, decay=0.99,
                dw_dtype=jnp.float32):
    """One LTD step. Returns (s, dw, trace_new) with the caller's shapes."""
    B, In = x.shape
    Out, In2 = weight.shape
    assert In == In2 and trace_prev.shape == (B, Out)

    # Pad rows to x8 and lanes to x128: lane-dense stores + valid BlockSpecs.
    Bp = _round_up(B, 8)
    InP = _round_up(In, 128)
    OutP = _round_up(Out, 128)
    xp = _prep(x, (Bp, InP))
    wp = _prep(weight, (OutP, InP))
    tp = _prep(trace_prev, (Bp, OutP))

    t_out = _pick_t_out(OutP)
    t_in = _pick(InP, (1024, 512, 256, 128))
    grid = (OutP // t_out, InP // t_in)

    dw_bytes = jnp.dtype(dw_dtype).itemsize
    block_bytes = (4 * (Bp * t_in + t_out * t_in + 3 * Bp * t_out)
                   + dw_bytes * t_out * t_in)
    vmem = _vmem_limit(2 * block_bytes + 4 * Bp * t_out)

    kernel = functools.partial(_ltd_step_kernel,
                               v_threshold=v_threshold, decay=decay)

    grid_spec = pltpu.PrefetchScalarGridSpec(
        num_scalar_prefetch=0,
        grid=grid,
        in_specs=[
            pl.BlockSpec((Bp, t_in), lambda j, k: (0, k)),       # x
            pl.BlockSpec((t_out, t_in), lambda j, k: (j, k)),    # W
            pl.BlockSpec((Bp, t_out), lambda j, k: (0, j)),      # trace_prev
        ],
        out_specs=[
            pl.BlockSpec((Bp, t_out), lambda j, k: (0, j)),      # s
            pl.BlockSpec((t_out, t_in), lambda j, k: (j, k)),    # dw
            pl.BlockSpec((Bp, t_out), lambda j, k: (0, j)),      # trace_new
        ],
        scratch_shapes=[pltpu.VMEM((Bp, t_out), jnp.float32)],
    )

    cost = pl.CostEstimate(
        flops=4 * Bp * InP * OutP,
        transcendentals=0,
        bytes_accessed=(4 * (Bp * InP + OutP * InP + 3 * Bp * OutP)
                        + dw_bytes * OutP * InP),
    )

    s, dw, trace_new = pl.pallas_call(
        kernel,
        out_shape=(
            jax.ShapeDtypeStruct((Bp, OutP), jnp.float32),
            jax.ShapeDtypeStruct((OutP, InP), dw_dtype),
            jax.ShapeDtypeStruct((Bp, OutP), jnp.float32),
        ),
        grid_spec=grid_spec,
        compiler_params=pltpu.CompilerParams(
            dimension_semantics=("parallel", "arbitrary"),
            vmem_limit_bytes=vmem),
        cost_estimate=cost,
        input_output_aliases={2: 2},   # trace_prev buffer reused for trace_new
    )(xp, wp, tp)
    return _crop(s, (B, Out)), _crop(dw, (Out, In)), _crop(trace_new, (B, Out))


# -----------------------------------------------------------------------------
# Fused T-step kernel: grid = (Out tiles [parallel], phase, In tiles).
#
#   phase 0: accumulate currents for ALL T steps (one (T*Bp, t_in) x (t_in,
#            t_out) matmul per In tile) into a VMEM buffer; at the last In
#            tile compute spikes, run the sequential trace scan (elementwise)
#            and overwrite the buffer with trace_ret for every step.
#   phase 1: dw[j, k] = trace_ret_all.T @ x[:, k]  (summed over the T chunk),
#            written once per (Out, In) tile.
#
# Equivalent to T sequential ltd_forward calls with the same (fixed) W, with
# dw returned summed over the chunk (apply it once per chunk).
# -----------------------------------------------------------------------------
def _ltd_fused_kernel(x_ref, w_ref, trace_ref, s_ref, dw_ref, trace_out_ref,
                      ibuf_ref, *, v_threshold, decay):
    p = pl.program_id(1)
    k = pl.program_id(2)
    nk = pl.num_programs(2)

    T, Bp, t_in = x_ref.shape
    t_out = ibuf_ref.shape[-1]
    TB = T * Bp

    x = x_ref[...].reshape(TB, t_in)             # time-flattened batch

    @pl.when(p == 0)
    def _accumulate_currents():
        part = lax.dot_general(x, w_ref[...], (((1,), (1,)), ((), ())),
                               preferred_element_type=jnp.float32)  # (TB, t_out)
        part = part.reshape(T, Bp, t_out)

        @pl.when(k == 0)
        def _():
            ibuf_ref[...] = part

        @pl.when(k > 0)
        def _():
            ibuf_ref[...] += part

        @pl.when(k == nk - 1)
        def _spikes_and_trace():
            s_all = (ibuf_ref[...] > v_threshold).astype(jnp.float32)
            s_ref[...] = s_all

            # Sequential trace recurrence (cheap, elementwise); overwrite the
            # current buffer with trace_ret_t so phase 1 can reuse it.
            def body(t, trace):
                trace_ret = trace * decay
                ibuf_ref[t] = trace_ret
                return trace_ret + s_ref[t]

            trace_out_ref[...] = lax.fori_loop(0, T, body, trace_ref[...])

    @pl.when(p == 1)
    def _summed_dw():
        tr_all = ibuf_ref[...].reshape(TB, t_out)   # trace_ret for all T steps
        dw_ref[...] = lax.dot_general(
            tr_all, x, (((0,), (0,)), ((), ())),
            preferred_element_type=jnp.float32).astype(dw_ref.dtype)


def ltd_forward_fused(xs, weight, trace_prev, *, v_threshold=0.5, decay=0.99,
                      dw_dtype=jnp.float32):
    """T fused LTD steps (W fixed over the chunk).

    xs: (T, B, In).  Returns (s, dw, trace_new) with s: (T, B, Out),
    dw: (Out, In) summed over the T chunk, trace_new: (B, Out).
    """
    T, B, In = xs.shape
    Out, In2 = weight.shape
    assert In == In2 and trace_prev.shape == (B, Out)

    Bp = _round_up(B, 8)
    InP = _round_up(In, 128)
    OutP = _round_up(Out, 128)
    xp = _prep(xs, (T, Bp, InP))
    wp = _prep(weight, (OutP, InP))
    tp = _prep(trace_prev, (Bp, OutP))

    t_out = _pick_t_out(OutP)
    t_in = _pick(InP, (512, 256, 128))
    n_k = InP // t_in
    grid = (OutP // t_out, 2, n_k)

    dw_bytes = jnp.dtype(dw_dtype).itemsize
    TB = T * Bp
    block_bytes = (4 * (TB * t_in + t_out * t_in + Bp * t_out
                        + TB * t_out + Bp * t_out)
                   + dw_bytes * t_out * t_in)
    vmem = _vmem_limit(2 * block_bytes + 4 * TB * t_out)

    kernel = functools.partial(_ltd_fused_kernel,
                               v_threshold=v_threshold, decay=decay)

    # W is only needed in phase 0; pin its block index during phase 1 so it is
    # not re-fetched.  dw's index is pinned to (j, 0) during phase 0 so every
    # visited index is written (consecutively) before writeback.
    w_index = lambda j, p, k: (j, k * (1 - p) + (n_k - 1) * p)
    dw_index = lambda j, p, k: (j, k * p)

    grid_spec = pltpu.PrefetchScalarGridSpec(
        num_scalar_prefetch=0,
        grid=grid,
        in_specs=[
            pl.BlockSpec((T, Bp, t_in), lambda j, p, k: (0, 0, k)),   # x
            pl.BlockSpec((t_out, t_in), w_index),                     # W
            pl.BlockSpec((Bp, t_out), lambda j, p, k: (0, j)),        # trace_prev
        ],
        out_specs=[
            pl.BlockSpec((T, Bp, t_out), lambda j, p, k: (0, 0, j)),  # s
            pl.BlockSpec((t_out, t_in), dw_index),                    # dw (summed)
            pl.BlockSpec((Bp, t_out), lambda j, p, k: (0, j)),        # trace_new
        ],
        scratch_shapes=[pltpu.VMEM((T, Bp, t_out), jnp.float32)],
    )

    cost = pl.CostEstimate(
        flops=4 * TB * InP * OutP,
        transcendentals=0,
        bytes_accessed=(4 * (2 * (OutP // t_out) * TB * InP   # x, streamed 2x/out-tile
                             + OutP * InP                     # W
                             + TB * OutP                      # s
                             + 2 * Bp * OutP)                 # trace in/out
                        + dw_bytes * OutP * InP),             # summed dw
    )

    s, dw, trace_new = pl.pallas_call(
        kernel,
        out_shape=(
            jax.ShapeDtypeStruct((T, Bp, OutP), jnp.float32),
            jax.ShapeDtypeStruct((OutP, InP), dw_dtype),
            jax.ShapeDtypeStruct((Bp, OutP), jnp.float32),
        ),
        grid_spec=grid_spec,
        compiler_params=pltpu.CompilerParams(
            dimension_semantics=("parallel", "arbitrary", "arbitrary"),
            vmem_limit_bytes=vmem),
        cost_estimate=cost,
        input_output_aliases={2: 2},
    )(xp, wp, tp)
    return (_crop(s, (T, B, Out)), _crop(dw, (Out, In)),
            _crop(trace_new, (B, Out)))


# -----------------------------------------------------------------------------
# Pure-JAX reference (mirrors the PyTorch module, functional trace state).
# -----------------------------------------------------------------------------
def _ltd_reference(x, weight, trace_prev, *, v_threshold=0.5, decay=0.99):
    i_cur = x @ weight.T
    s = (i_cur > v_threshold).astype(jnp.float32)
    trace_ret = trace_prev * decay
    dw = trace_ret.T @ x
    return s, dw, trace_ret + s


if __name__ == "__main__":
    # Small deterministic example consistent with nn.Linear(32, 16, bias=False).
    B, In, Out, T = 2, 32, 16, 4
    key = jax.random.PRNGKey(0)
    kx, kw = jax.random.split(key)
    xs = jax.random.normal(kx, (T, B, In), dtype=jnp.float32)
    bound = 1.0 / (In ** 0.5)
    weight = jax.random.uniform(kw, (Out, In), minval=-bound, maxval=bound,
                                dtype=jnp.float32)
    trace0 = jnp.zeros((B, Out), dtype=jnp.float32)   # trace starts at zeros

    # --- single-step kernel, called twice (exercises the decayed-trace path) ---
    s1, dw1, tr1 = ltd_forward(xs[0], weight, trace0)
    s2, dw2, tr2 = ltd_forward(xs[1], weight, tr1)
    jax.block_until_ready((s1, dw1, tr1, s2, dw2, tr2))

    rs1, rdw1, rt1 = _ltd_reference(xs[0], weight, trace0)
    rs2, rdw2, rt2 = _ltd_reference(xs[1], weight, rt1)
    assert jnp.allclose(s1, rs1) and jnp.allclose(dw1, rdw1, atol=1e-5)
    assert jnp.allclose(tr1, rt1, atol=1e-5)
    assert jnp.allclose(s2, rs2) and jnp.allclose(dw2, rdw2, atol=1e-5)
    assert jnp.allclose(tr2, rt2, atol=1e-5)

    # --- fused T-step kernel (W held fixed; dw summed over the chunk) ---
    sF, dwF, trF = ltd_forward_fused(xs, weight, trace0)
    jax.block_until_ready((sF, dwF, trF))

    tr_state = trace0
    dw_sum = jnp.zeros_like(weight)
    for t in range(T):
        rs, rdw, tr_state = _ltd_reference(xs[t], weight, tr_state)
        assert jnp.allclose(sF[t], rs)
        dw_sum = dw_sum + rdw
    assert jnp.allclose(dwF, dw_sum, atol=1e-5)
    assert jnp.allclose(trF, tr_state, atol=1e-5)

    # --- fused kernel with bf16 dw output (f32 accumulate, bf16 final store) ---
    sB, dwB, trB = ltd_forward_fused(xs, weight, trace0, dw_dtype=jnp.bfloat16)
    jax.block_until_ready((sB, dwB, trB))
    assert jnp.allclose(sB, sF)
    assert jnp.allclose(trB, trF, atol=1e-5)
    assert jnp.allclose(dwB.astype(jnp.float32), dw_sum, rtol=2e-2, atol=2e-2)

    print("KERNEL_OK")
</pallas_src>

<mosaic_0001>
module attributes {stable_mosaic.version = 11 : i64} {
  func.func @_ltd_step_kernel(%arg0: i32, %arg1: i32, %arg2: memref<8x128xf32, #tpu.memory_space<vmem>>, %arg3: memref<128x128xf32, #tpu.memory_space<vmem>>, %arg4: memref<8x128xf32, #tpu.memory_space<vmem>>, %arg5: memref<8x128xf32, #tpu.memory_space<vmem>>, %arg6: memref<128x128xf32, #tpu.memory_space<vmem>>, %arg7: memref<8x128xf32, #tpu.memory_space<vmem>>, %arg8: memref<8x128xf32, #tpu.memory_space<vmem>>) attributes {dimension_semantics = [#tpu.dimension_semantics<parallel>, #tpu.dimension_semantics<arbitrary>], iteration_bounds = array<i64: 1, 1>, scalar_prefetch = 0 : i64, scratch_operands = 1 : i64, tpu.core_type = #tpu.core_type<tc>, window_params = [{transform_indices = @transform_0, window_bounds = array<i64: 8, 128>}, {transform_indices = @transform_1, window_bounds = array<i64: 128, 128>}, {transform_indices = @transform_2, window_bounds = array<i64: 8, 128>}, {transform_indices = @transform_3, window_bounds = array<i64: 8, 128>}, {transform_indices = @transform_4, window_bounds = array<i64: 128, 128>}, {transform_indices = @transform_5, window_bounds = array<i64: 8, 128>}]} {
    %c0 = arith.constant 0 : index
    %c0_0 = arith.constant 0 : index
    %0 = vector.load %arg2[%c0, %c0_0] : memref<8x128xf32, #tpu.memory_space<vmem>>, vector<8x128xf32>
    %c0_1 = arith.constant 0 : index
    %c0_2 = arith.constant 0 : index
    %1 = vector.load %arg3[%c0_1, %c0_2] : memref<128x128xf32, #tpu.memory_space<vmem>>, vector<128x128xf32>
    %cst = arith.constant dense<0.000000e+00> : vector<8x128xf32>
    %2 = tpu.matmul %0, %1, %cst {dimension_numbers = #tpu.dot_dimension_numbers<[1], [1], [0], [0], [0, 0, 1, 0], [], []>} : vector<8x128xf32>, vector<128x128xf32>, vector<8x128xf32> -> vector<8x128xf32>
    %c0_i32 = arith.constant 0 : i32
    %3 = arith.cmpi eq, %arg1, %c0_i32 : i32
    %4 = arith.extui %3 : i1 to i32
    %c0_i32_3 = arith.constant 0 : i32
    %5 = arith.cmpi ne, %4, %c0_i32_3 : i32
    scf.if %5 {
      %c0_14 = arith.constant 0 : index
      %c0_15 = arith.constant 0 : index
      %17 = vector.load %arg8[%c0_14, %c0_15] : memref<8x128xf32, #tpu.memory_space<vmem>>, vector<8x128xf32>
      tpu.vector_store %arg8[%c0_14, %c0_15], %2 {strides = array<i32>} : memref<8x128xf32, #tpu.memory_space<vmem>>, vector<8x128xf32>,
    } else {
    }
    %c0_i32_4 = arith.constant 0 : i32
    %6 = arith.cmpi sgt, %arg1, %c0_i32_4 : i32
    %7 = arith.extui %6 : i1 to i32
    %c0_i32_5 = arith.constant 0 : i32
    %8 = arith.cmpi ne, %7, %c0_i32_5 : i32
    scf.if %8 {
      %c0_14 = arith.constant 0 : index
      %c0_15 = arith.constant 0 : index
      %17 = vector.load %arg8[%c0_14, %c0_15] : memref<8x128xf32, #tpu.memory_space<vmem>>, vector<8x128xf32>
      %18 = arith.addf %17, %2 : vector<8x128xf32>
      %c0_16 = arith.constant 0 : index
      %c0_17 = arith.constant 0 : index
      %19 = vector.load %arg8[%c0_16, %c0_17] : memref<8x128xf32, #tpu.memory_space<vmem>>, vector<8x128xf32>
      tpu.vector_store %arg8[%c0_16, %c0_17], %18 {strides = array<i32>} : memref<8x128xf32, #tpu.memory_space<vmem>>, vector<8x128xf32>,
    } else {
    }
    %c0_6 = arith.constant 0 : index
    %c0_7 = arith.constant 0 : index
    %9 = vector.load %arg4[%c0_6, %c0_7] : memref<8x128xf32, #tpu.memory_space<vmem>>, vector<8x128xf32>
    %cst_8 = arith.constant 9.900000e-01 : f32
    %10 = vector.broadcast %cst_8 : f32 to vector<8x128xf32>
    %11 = arith.mulf %9, %10 : vector<8x128xf32>
    %cst_9 = arith.constant dense<0.000000e+00> : vector<128x128xf32>
    %12 = tpu.matmul %11, %0, %cst_9 {dimension_numbers = #tpu.dot_dimension_numbers<[0], [0], [1], [1], [0, 1, 1, 1], [], []>} : vector<8x128xf32>, vector<8x128xf32>, vector<128x128xf32> -> vector<128x128xf32>
    %c0_10 = arith.constant 0 : index
    %c0_11 = arith.constant 0 : index
    %13 = vector.load %arg6[%c0_10, %c0_11] : memref<128x128xf32, #tpu.memory_space<vmem>>, vector<128x128xf32>
    tpu.vector_store %arg6[%c0_10, %c0_11], %12 {strides = array<i32>} : memref<128x128xf32, #tpu.memory_space<vmem>>, vector<128x128xf32>,
    %c0_i32_12 = arith.constant 0 : i32
    %14 = arith.cmpi eq, %arg1, %c0_i32_12 : i32
    %15 = arith.extui %14 : i1 to i32
    %c0_i32_13 = arith.constant 0 : i32
    %16 = arith.cmpi ne, %15, %c0_i32_13 : i32
    scf.if %16 {
      %c0_14 = arith.constant 0 : index
      %c0_15 = arith.constant 0 : index
      %17 = vector.load %arg8[%c0_14, %c0_15] : memref<8x128xf32, #tpu.memory_space<vmem>>, vector<8x128xf32>
      %cst_16 = arith.constant 5.000000e-01 : f32
      %18 = vector.broadcast %cst_16 : f32 to vector<8x128xf32>
      %19 = arith.cmpf ogt, %17, %18 : vector<8x128xf32>
      %20 = arith.extui %19 : vector<8x128xi1> to vector<8x128xi32>
      %21 = arith.sitofp %20 : vector<8x128xi32> to vector<8x128xf32>
      %c0_17 = arith.constant 0 : index
      %c0_18 = arith.constant 0 : index
      %22 = vector.load %arg5[%c0_17, %c0_18] : memref<8x128xf32, #tpu.memory_space<vmem>>, vector<8x128xf32>
      tpu.vector_store %arg5[%c0_17, %c0_18], %21 {strides = array<i32>} : memref<8x128xf32, #tpu.memory_space<vmem>>, vector<8x128xf32>,
      %23 = arith.addf %11, %21 : vector<8x128xf32>
      %c0_19 = arith.constant 0 : index
      %c0_20 = arith.constant 0 : index
      %24 = vector.load %arg7[%c0_19, %c0_20] : memref<8x128xf32, #tpu.memory_space<vmem>>, vector<8x128xf32>
      tpu.vector_store %arg7[%c0_19, %c0_20], %23 {strides = array<i32>} : memref<8x128xf32, #tpu.memory_space<vmem>>, vector<8x128xf32>,
    } else {
    }
    return
  }
  func.func @transform_0(%arg0: i32, %arg1: i32) -> (i32, i32) {
    %c0_i32 = arith.constant 0 : i32
    %c0_i32_0 = arith.constant 0 : i32
    return %c0_i32, %arg1 : i32, i32
  }
  func.func @transform_1(%arg0: i32, %arg1: i32) -> (i32, i32) {
    %c0_i32 = arith.constant 0 : i32
    return %arg0, %arg1 : i32, i32
  }
  func.func @transform_2(%arg0: i32, %arg1: i32) -> (i32, i32) {
    %c0_i32 = arith.constant 0 : i32
    %c0_i32_0 = arith.constant 0 : i32
    return %c0_i32, %arg0 : i32, i32
  }
  func.func @transform_3(%arg0: i32, %arg1: i32) -> (i32, i32) {
    %c0_i32 = arith.constant 0 : i32
    %c0_i32_0 = arith.constant 0 : i32
    return %c0_i32, %arg0 : i32, i32
  }
  func.func @transform_4(%arg0: i32, %arg1: i32) -> (i32, i32) {
    %c0_i32 = arith.constant 0 : i32
    return %arg0, %arg1 : i32, i32
  }
  func.func @transform_5(%arg0: i32, %arg1: i32) -> (i32, i32) {
    %c0_i32 = arith.constant 0 : i32
    %c0_i32_0 = arith.constant 0 : i32
    return %c0_i32, %arg0 : i32, i32
  }
}

</mosaic_0001>

<bundles_post_ra>
// kernel: tpu_custom_call.1
= control target key start
LH: loop header
LB: loop body
LE: loop exit
PB: predicated region body
PF: predicated region fallthrough
CT: control target
= control target key end

     0   :  { %11 = vsyncpa [#allocation4], 0  ;;  %s836_s0 = inlined_call_operand.vmem [shape: f32[8,128], index: 0, kind: input, shape index: {}]   ;;  %s837_s1 = inlined_call_operand.hbm [shape: f32[128,128], index: 1, kind: input, shape index: {}]   ;;  %s838_s2 = inlined_call_operand.hbm [shape: f32[8,128], index: 2, kind: input, shape index: {}, may-alias: {2,5}]   ;;  %s839_s3 = inlined_call_operand.hbm [shape: f32[8,128], index: 3, kind: output, shape index: {0}]   ;;  %s840_s4 = inlined_call_operand.hbm [shape: f32[128,128], index: 4, kind: output, shape index: {1}]   ;;  %s841_s5 = inlined_call_operand.hbm [shape: f32[8,128], index: 5, kind: output, shape index: {2}, may-alias: {2,5}]  }
   0x1   :  { %12 = vsyncpa [#allocation7], 0 }
   0x2   :  { %13 = vsyncpa [#allocation5], 0 }
   0x3   :  { %14 = vsyncpa [#allocation10], 0  ;;  %s707_s18 = smov [#allocation3]   ;;  %s589_s22 = scalar_lea.hbm %s837_s1, 2048 }
   0x4   :  { %s22_s19 = sshll.u32 %s707_s18, 4  ;;  %p590_p0 = scmp.ne.s32.totalorder %s837_s1, %s589_s22  ;;  %s23_s19 = int_to_ptr.vmem [resolvable:$true] %s22_s19 }
   0x5   :  { %p593_p1 = scmp.lt.u32.totalorder %s589_s22, %s837_s1 }
   0x7   :  { %p595_p2 = pnand %p593_p1, %p590_p0 }
   0x9   :  { %598 = shalt.err (!%p595_p2)
}
   0xa   :  { %s599_s27 = scalar_lea.vmem %s23_s19, 2048  ;;  %p604_p4 = scmp.lt.s32.totalorder %s23_s19, %s23_s19 }
   0xb   :  { %p600_p3 = scmp.ne.s32.totalorder %s23_s19, %s599_s27  ;;  %p605_p5 = scmp.lt.s32.totalorder %s599_s27, %s599_s27 }
   0xd   :  { %p606_p6 = por %p605_p5, %p604_p4 }
   0xf   :  { %p607_p7 = pnand %p606_p6, %p600_p3 }
  0x11   :  { %610 = shalt.err (!%p607_p7)
}
  0x12   :  { %s708_s28 = smov 128   ;;  %s709_s29 = smov 8  }
  0x13   :  { %28 = dma.hbm_to_vmem [thread:$0]  %s837_s1, 2048, %s23_s19, [#allocation4], %s708_s28, %s708_s28, %s709_s29  }
  0x14   :  { %s710_s7 = smov [#allocation6]   ;;  %s611_s11 = scalar_lea.hbm %s838_s2, 128 }
  0x15   :  { %s35_s8 = sshll.u32 %s710_s7, 4  ;;  %p612_p8 = scmp.ne.s32.totalorder %s838_s2, %s611_s11  ;;  %s36_s8 = int_to_ptr.vmem [resolvable:$true] %s35_s8 }
  0x16   :  { %p615_p9 = scmp.lt.u32.totalorder %s611_s11, %s838_s2 }
  0x18   :  { %p617_p10 = pnand %p615_p9, %p612_p8 }
  0x1a   :  { %620 = shalt.err (!%p617_p10)
}
  0x1b   :  { %s621_s16 = scalar_lea.vmem %s36_s8, 128  ;;  %p626_p12 = scmp.lt.s32.totalorder %s36_s8, %s36_s8 }
  0x1c   :  { %p622_p11 = scmp.ne.s32.totalorder %s36_s8, %s621_s16  ;;  %p627_p13 = scmp.lt.s32.totalorder %s621_s16, %s621_s16 }
  0x1e   :  { %p628_p0 = por %p627_p13, %p626_p12 }
  0x20   :  { %p629_p1 = pnand %p628_p0, %p622_p11 }
  0x22   :  { %632 = shalt.err (!%p629_p1)
}
  0x23   :  { %38 = dma.hbm_to_vmem [thread:$0]  %s838_s2, 128, %s36_s8, [#allocation7]  }
  0x24   :  { %699 = dma.done.wait [#allocation4], 2048  }
  0x25   :  { %700 = vsyncadd [#allocation4], 4294965248 }
  0x26   :  { %701 = dma.done.wait [#allocation7], 128  }
  0x27   :  { %702 = vsyncadd [#allocation7], 4294967168  ;;  %v711_v0 = vmov 0.0|0.0   ;;  %v144_v1 = vld [vmem:[#allocation6] sm:$0xff]  ;;  %v47_v3 = vld [vmem:[#allocation3 + $0x8] sm:$0xff]  ;;  %vm712_vm0 = vmmov 0  }
  0x28   :  { %555 = vmatprep.subr.bf16.mxu0 %v711_v0  ;;  %v46_v2 = vld [vmem:[#allocation3] sm:$0xff]  ;;  %v774_v4 = vmul.f32 0.99, %v144_v1  ;;  %v48_v6 = vld [vmem:[#allocation3 + $0x10] sm:$0xff]  ;;  %v49_v7 = vld [vmem:[#allocation3 + $0x18] sm:$0xff]  ;;  %v713_v28 = vmov 0.0  }
  0x29   :  { %v556_v5 = vpack.c.bf16 %v47_v3, %v46_v2  ;;  %v45_v8 = vld [vmem:[%s836_s0] sm:$0xff]  ;;  %v559_v9 = vpack.c.bf16 %v49_v7, %v48_v6  ;;  %v50_v10 = vld [vmem:[#allocation3 + $0x20] sm:$0xff]  ;;  %v51_v11 = vld [vmem:[#allocation3 + $0x28] sm:$0xff]  ;;  %526 = vmatprep.mubr.msk.f32.mxu0 %vm712_vm0, %v713_v28  ;;  %vm178_vm1 = vcmask 64512   ;;  %s714_s0 = smov [#allocation8]  }
  0x2a   :  { %146 = vxpose.xlu0.b32.start.end [1/1] (short) %v774_v4, 128  ;;  %529 = vmatprep.subr.mxu1 %v45_v8  ;;  %v562_v12 = vpack.c.bf16 %v51_v11, %v50_v10  ;;  %v52_v13 = vld [vmem:[#allocation3 + $0x30] sm:$0xff]  ;;  %v53_v14 = vld [vmem:[#allocation3 + $0x38] sm:$0xff]  ;;  %v54_v16 = vld [vmem:[#allocation3 + $0x40] sm:$0xff]  ;;  %s404_s19 = sshll.u32 %s714_s0, 4  ;;  %s405_s19 = int_to_ptr.vmem [resolvable:$true] %s404_s19 }
  0x2b   :  { %557 = vmatpush3.bf16.xpose.msra.mxu0 %v556_v5  ;;  %530 = vmatpush3.msra.mxu1 %v45_v8  ;;  %v565_v15 = vpack.c.bf16 %v53_v14, %v52_v13  ;;  %v55_v17 = vld [vmem:[#allocation3 + $0x48] sm:$0xff]  ;;  %v56_v19 = vld [vmem:[#allocation3 + $0x50] sm:$0xff]  ;;  %v57_v20 = vld [vmem:[#allocation3 + $0x58] sm:$0xff]  ;;  %s633_s20 = scalar_lea.vmem %s405_s19, 128  ;;  %p638_p3 = scmp.lt.s32.totalorder %s405_s19, %s405_s19 }
  0x2c   :  { %558 = vmatprep.subr.bf16.mxu0 %v711_v0  ;;  %v568_v18 = vpack.c.bf16 %v55_v17, %v54_v16  ;;  %v571_v21 = vpack.c.bf16 %v57_v20, %v56_v19  ;;  %v58_v22 = vld [vmem:[#allocation3 + $0x60] sm:$0xff]  ;;  %v59_v23 = vld [vmem:[#allocation3 + $0x68] sm:$0xff]  ;;  %v60_v25 = vld [vmem:[#allocation3 + $0x70] sm:$0xff]  ;;  %p634_p2 = scmp.ne.s32.totalorder %s405_s19, %s633_s20  ;;  %p639_p4 = scmp.lt.s32.totalorder %s633_s20, %s633_s20 }
  0x2d   :  { %v574_v24 = vpack.c.bf16 %v59_v23, %v58_v22  ;;  %v61_v26 = vld [vmem:[#allocation3 + $0x78] sm:$0xff] }
  0x2e   :  { %v577_v27 = vpack.c.bf16 %v61_v26, %v60_v25  ;;  %p640_p5 = por %p639_p4, %p638_p3 }
  0x30   :  { %p641_p6 = pnand %p640_p5, %p634_p2 }
  0x33   :  { %560 = vmatpush3.bf16.xpose.msra.mxu0 %v559_v9 }
  0x34   :  { %561 = vmatprep.subr.bf16.mxu0 %v711_v0 }
  0x3b   :  { %563 = vmatpush3.bf16.xpose.msra.mxu0 %v562_v12 }
  0x3c   :  { %564 = vmatprep.subr.bf16.mxu0 %v711_v0 }
  0x43   :  { %566 = vmatpush3.bf16.xpose.msra.mxu0 %v565_v15 }
  0x44   :  { %567 = vmatprep.subr.bf16.mxu0 %v711_v0 }
  0x4b   :  { %569 = vmatpush3.bf16.xpose.msra.mxu0 %v568_v18 }
  0x4c   :  { %570 = vmatprep.subr.bf16.mxu0 %v711_v0 }
  0x53   :  { %572 = vmatpush3.bf16.xpose.msra.mxu0 %v571_v21 }
  0x54   :  { %573 = vmatprep.subr.bf16.mxu0 %v711_v0 }
  0x5b   :  { %575 = vmatpush3.bf16.xpose.msra.mxu0 %v574_v24 }
  0x5c   :  { %576 = vmatprep.subr.bf16.mxu0 %v711_v0 }
  0x63   :  { %578 = vmatpush3.bf16.xpose.msra.mxu0 %v577_v27 }
  0x6a   :  { %527 = vmatmul.mubr.f32.vlgmr.msra.gmra.mrb[0].mxu0 %v45_v8 }
  0xaa   :  { %v162_v29 = vpop.trf.xlu0 }
  0xab   :  { %531 = vmatprep.mubr.msk.f32.mxu1 %vm178_vm1, %v162_v29 }
  0xae   :  { %v163_v30 = vpop.trf.xlu0 }
  0xaf   :  { %532 = vmatmul.mubr.msk.f32.vlgmr.msra.gmra.mrb[0].mxu1 %vm178_vm1, %v163_v30 }
  0xb2   :  { %v164_v31 = vpop.trf.xlu0 }
  0xb3   :  { %534 = vmatprep.mubr.msk.f32.mxu1 %vm178_vm1, %v164_v31 }
  0xb6   :  { %v165_v32 = vpop.trf.xlu0 }
  0xb7   :  { %535 = vmatmul.mubr.msk.f32.gmra.mrb[2].mxu1 %vm178_vm1, %v165_v32 }
  0xba   :  { %v166_v33 = vpop.trf.xlu0 }
  0xbb   :  { %537 = vmatprep.mubr.msk.f32.mxu1 %vm178_vm1, %v166_v33 }
  0xbe   :  { %v167_v34 = vpop.trf.xlu0 }
  0xbf   :  { %538 = vmatmul.mubr.msk.f32.gmra.mrb[4].mxu1 %vm178_vm1, %v167_v34 }
  0xc2   :  { %v168_v35 = vpop.trf.xlu0 }
  0xc3   :  { %540 = vmatprep.mubr.msk.f32.mxu1 %vm178_vm1, %v168_v35 }
  0xc6   :  { %v169_v36 = vpop.trf.xlu0 }
  0xc7   :  { %541 = vmatmul.mubr.msk.f32.gmra.mrb[6].mxu1 %vm178_vm1, %v169_v36 }
  0xca   :  { %v170_v37 = vpop.trf.xlu0 }
  0xcb   :  { %543 = vmatprep.mubr.msk.f32.mxu1 %vm178_vm1, %v170_v37 }
  0xce   :  { %v171_v38 = vpop.trf.xlu0 }
  0xcf   :  { %544 = vmatmul.mubr.msk.f32.gmra.mrb[8].mxu1 %vm178_vm1, %v171_v38 }
  0xd2   :  { %v172_v39 = vpop.trf.xlu0 }
  0xd3   :  { %546 = vmatprep.mubr.msk.f32.mxu1 %vm178_vm1, %v172_v39 }
  0xd6   :  { %v173_v40 = vpop.trf.xlu0 }
  0xd7   :  { %547 = vmatmul.mubr.msk.f32.gmra.mrb[10].mxu1 %vm178_vm1, %v173_v40 }
  0xda   :  { %v174_v41 = vpop.trf.xlu0 }
  0xdb   :  { %549 = vmatprep.mubr.msk.f32.mxu1 %vm178_vm1, %v174_v41 }
  0xde   :  { %v175_v42 = vpop.trf.xlu0 }
  0xdf   :  { %550 = vmatmul.mubr.msk.f32.gmra.mrb[12].mxu1 %vm178_vm1, %v175_v42 }
  0xe2   :  { %v176_v43 = vpop.trf.xlu0 }
  0xe3   :  { %552 = vmatprep.mubr.msk.f32.mxu1 %vm178_vm1, %v176_v43 }
  0xe6   :  { %v177_v44 = vpop.trf.xlu0 }
  0xe7   :  { %553 = vmatmul.mubr.msk.f32.gmra.mrb[14].mxu1 %vm178_vm1, %v177_v44 }
 0x13d   :  { %v128_v45 = vpop.f32.mrb[0].mxu0 }
 0x13e   :  { %vm392_vm2 = vcmp.gt.f32.partialorder %v128_v45, 0.5  ;;  %v528_v46 = vpop.f32.mrb[1].mxu0 }
 0x13f   :  { %v459_v47 = vsel %vm392_vm2, 1.0, %v713_v28 }
 0x140   :  { %v396_v48 = vadd.f32 %v459_v47, %v774_v4  ;;  %395 = vst [vmem:[#allocation8] sm:$0xff] %v459_v47 }
 0x141   :  { %644 = shalt.err (!%p641_p6)
}
 0x142   :  { %s645_s23 = scalar_lea.hbm %s839_s3, 128 }
 0x143   :  { %p646_p7 = scmp.ne.s32.totalorder %s839_s3, %s645_s23  ;;  %p649_p8 = scmp.lt.u32.totalorder %s645_s23, %s839_s3 }
 0x145   :  { %p651_p9 = pnand %p649_p8, %p646_p7 }
 0x147   :  { %654 = shalt.err (!%p651_p9)
}
 0x148   :  { %407 = dma.vmem_to_hbm [thread:$0]  %s405_s19, 128, %s839_s3, [#allocation5]   ;;  %397 = vst [vmem:[#allocation11] sm:$0xff] %v396_v48 }
 0x149   :  { %s715_s3 = smov [#allocation9]   ;;  %s716_s8 = smov [#allocation11]  }
 0x14a   :  { %s413_s7 = sshll.u32 %s715_s3, 4  ;;  %s426_s9 = sshll.u32 %s716_s8, 4  ;;  %s414_s7 = int_to_ptr.vmem [resolvable:$true] %s413_s7  ;;  %s427_s9 = int_to_ptr.vmem [resolvable:$true] %s426_s9 }
 0x14b   :  { %s655_s10 = scalar_lea.vmem %s414_s7, 2048  ;;  %p660_p11 = scmp.lt.s32.totalorder %s414_s7, %s414_s7 }
 0x14c   :  { %p656_p10 = scmp.ne.s32.totalorder %s414_s7, %s655_s10  ;;  %p661_p12 = scmp.lt.s32.totalorder %s655_s10, %s655_s10 }
 0x14e   :  { %p662_p13 = por %p661_p12, %p660_p11 }
 0x150   :  { %p663_p0 = pnand %p662_p13, %p656_p10 }
 0x182   :  { %v533_v49 = vpop.f32.mrb[0].mxu1 }
 0x183   :  { %373 = vst [vmem:[#allocation9 + $0x8] sm:$0xff] %v533_v49  ;;  %v293_v50 = vpop.f32.mrb[1].mxu1 }
 0x184   :  { %372 = vst [vmem:[#allocation9] sm:$0xff] %v293_v50 }
 0x18a   :  { %v536_v51 = vpop.f32.mrb[2].mxu1 }
 0x18b   :  { %375 = vst [vmem:[#allocation9 + $0x18] sm:$0xff] %v536_v51  ;;  %v303_v52 = vpop.f32.mrb[3].mxu1 }
 0x18c   :  { %374 = vst [vmem:[#allocation9 + $0x10] sm:$0xff] %v303_v52 }
 0x192   :  { %v539_v53 = vpop.f32.mrb[4].mxu1 }
 0x193   :  { %377 = vst [vmem:[#allocation9 + $0x28] sm:$0xff] %v539_v53  ;;  %v313_v54 = vpop.f32.mrb[5].mxu1 }
 0x194   :  { %376 = vst [vmem:[#allocation9 + $0x20] sm:$0xff] %v313_v54 }
 0x19a   :  { %v542_v55 = vpop.f32.mrb[6].mxu1 }
 0x19b   :  { %379 = vst [vmem:[#allocation9 + $0x38] sm:$0xff] %v542_v55  ;;  %v323_v56 = vpop.f32.mrb[7].mxu1 }
 0x19c   :  { %378 = vst [vmem:[#allocation9 + $0x30] sm:$0xff] %v323_v56 }
 0x1a2   :  { %v545_v57 = vpop.f32.mrb[8].mxu1 }
 0x1a3   :  { %381 = vst [vmem:[#allocation9 + $0x48] sm:$0xff] %v545_v57  ;;  %v333_v58 = vpop.f32.mrb[9].mxu1 }
 0x1a4   :  { %380 = vst [vmem:[#allocation9 + $0x40] sm:$0xff] %v333_v58 }
 0x1aa   :  { %v548_v59 = vpop.f32.mrb[10].mxu1 }
 0x1ab   :  { %383 = vst [vmem:[#allocation9 + $0x58] sm:$0xff] %v548_v59  ;;  %v343_v60 = vpop.f32.mrb[11].mxu1 }
 0x1ac   :  { %382 = vst [vmem:[#allocation9 + $0x50] sm:$0xff] %v343_v60 }
 0x1b2   :  { %v551_v61 = vpop.f32.mrb[12].mxu1 }
 0x1b3   :  { %385 = vst [vmem:[#allocation9 + $0x68] sm:$0xff] %v551_v61  ;;  %v353_v62 = vpop.f32.mrb[13].mxu1 }
 0x1b4   :  { %384 = vst [vmem:[#allocation9 + $0x60] sm:$0xff] %v353_v62 }
 0x1ba   :  { %v554_v63 = vpop.f32.mrb[14].mxu1 }
 0x1bb   :  { %387 = vst [vmem:[#allocation9 + $0x78] sm:$0xff] %v554_v63  ;;  %v363_v0 = vpop.f32.mrb[15].mxu1 }
 0x1bc   :  { %386 = vst [vmem:[#allocation9 + $0x70] sm:$0xff] %v363_v0 }
 0x1bd   :  { %666 = shalt.err (!%p663_p0)
}
 0x1be   :  { %s667_s13 = scalar_lea.hbm %s840_s4, 2048 }
 0x1bf   :  { %p668_p1 = scmp.ne.s32.totalorder %s840_s4, %s667_s13  ;;  %p671_p2 = scmp.lt.u32.totalorder %s667_s13, %s840_s4 }
 0x1c1   :  { %p673_p3 = pnand %p671_p2, %p668_p1 }
 0x1c3   :  { %676 = shalt.err (!%p673_p3)
}
 0x1c4   :  { %419 = dma.vmem_to_hbm [thread:$0]  %s414_s7, 2048, %s840_s4, [#allocation10], %s708_s28, %s708_s28, %s709_s29  }
 0x1c5   :  { %s677_s2 = scalar_lea.vmem %s427_s9, 128  ;;  %p682_p5 = scmp.lt.s32.totalorder %s427_s9, %s427_s9 }
 0x1c6   :  { %p678_p4 = scmp.ne.s32.totalorder %s427_s9, %s677_s2  ;;  %p683_p6 = scmp.lt.s32.totalorder %s677_s2, %s677_s2 }
 0x1c8   :  { %p684_p7 = por %p683_p6, %p682_p5 }
 0x1ca   :  { %p685_p8 = pnand %p684_p7, %p678_p4 }
 0x1cc   :  { %688 = shalt.err (!%p685_p8)
}
 0x1cd   :  { %s689_s20 = scalar_lea.hbm %s841_s5, 128 }
 0x1ce   :  { %p690_p9 = scmp.ne.s32.totalorder %s841_s5, %s689_s20  ;;  %p693_p10 = scmp.lt.u32.totalorder %s689_s20, %s841_s5 }
 0x1d0   :  { %p695_p11 = pnand %p693_p10, %p690_p9 }
 0x1d2   :  { %698 = shalt.err (!%p695_p11)
}
 0x1d3   :  { %429 = dma.vmem_to_hbm [thread:$0]  %s427_s9, 128, %s841_s5, [#allocation10]  }
 0x1d4   :  { %703 = dma.done.wait [#allocation5], 128  }
 0x1d5   :  { %704 = vsyncadd [#allocation5], 4294967168 }
 0x1d6   :  { %705 = dma.done.wait [#allocation10], 2176  }
 0x1d7   :  { %706 = vsyncadd [#allocation10], 4294965120 }
 0x1d8   :  { %439 = vsyncpa [#allocation4], 1 }
 0x1d9   :  { %440 = vsyncpa [#allocation7], 1 }
 0x1da   :  { %441 = vsyncpa [#allocation5], 1 }
 0x1db   :  { %442 = vsyncpa [#allocation10], 1 }

</bundles_post_ra>
